<compile_context>
chip_gen: v6e
topology: v6e:2x2x1
jax: 0.10.0
libtpu: 0.0.40
codegen_flags: <defaults>
</compile_context>

<pallas_src>
import functools

import jax
import jax.numpy as jnp
from jax.experimental import pallas as pl
from jax.experimental.pallas import tpu as pltpu


# ----------------------------- helpers -------------------------------------- #
def _round_up(x, m):
    return (x + m - 1) // m * m


def _pad2(x, shape):
    return jnp.pad(x, ((0, shape[0] - x.shape[0]), (0, shape[1] - x.shape[1])))


def _pick_tile(n, candidates):
    for c in candidates:
        if n % c == 0:
            return c
    return n


# ----------------------------- Pallas kernels -------------------------------- #
def dense_kernel(x_ref, w_ref, b_ref, o_ref, *, apply_relu):
    """Row-tiled act(X @ W + b). x/w are bf16, accumulation in f32."""
    acc = jnp.dot(x_ref[...], w_ref[...], preferred_element_type=jnp.float32)
    acc = acc + b_ref[...]
    if apply_relu:
        acc = jnp.maximum(acc, 0.0)
    o_ref[...] = acc.astype(o_ref.dtype)


def aggregate_kernel(a_ref, xw_ref, b_ref, o_ref, acc_ref, *, apply_relu):
    """act(A @ XW + b), reduction over A-column tiles (grid axis 1)."""
    k = pl.program_id(1)

    @pl.when(k == 0)
    def _():
        acc_ref[...] = jnp.zeros_like(acc_ref)

    acc_ref[...] += jnp.dot(a_ref[...], xw_ref[...],
                            preferred_element_type=jnp.float32)

    @pl.when(k == pl.num_programs(1) - 1)
    def _():
        r = acc_ref[...] + b_ref[...]
        if apply_relu:
            r = jnp.maximum(r, 0.0)
        o_ref[...] = r.astype(o_ref.dtype)


# ----------------------------- pallas_call wrappers --------------------------- #
def _dense(x, w, b, *, apply_relu, out_dtype, tm):
    rows, cin = x.shape
    cout = w.shape[1]
    kernel = functools.partial(dense_kernel, apply_relu=apply_relu)
    return pl.pallas_call(
        kernel,
        out_shape=jax.ShapeDtypeStruct((rows, cout), out_dtype),
        grid_spec=pltpu.PrefetchScalarGridSpec(
            num_scalar_prefetch=0,
            grid=(rows // tm,),
            in_specs=[
                pl.BlockSpec((tm, cin), lambda i: (i, 0)),
                pl.BlockSpec((cin, cout), lambda i: (0, 0)),
                pl.BlockSpec((1, cout), lambda i: (0, 0)),
            ],
            out_specs=pl.BlockSpec((tm, cout), lambda i: (i, 0)),
        ),
        compiler_params=pltpu.CompilerParams(
            dimension_semantics=("parallel",)),
    )(x, w, b)


def _aggregate(a, xw, b, *, apply_relu, out_dtype, tm, tk):
    rows = a.shape[0]
    cout = xw.shape[1]
    kernel = functools.partial(aggregate_kernel, apply_relu=apply_relu)
    cost = pl.CostEstimate(
        flops=2 * rows * rows * cout,
        transcendentals=0,
        bytes_accessed=int(a.size * a.dtype.itemsize
                           + (rows // tm) * xw.size * xw.dtype.itemsize
                           + rows * cout * jnp.dtype(out_dtype).itemsize),
    )
    return pl.pallas_call(
        kernel,
        out_shape=jax.ShapeDtypeStruct((rows, cout), out_dtype),
        grid_spec=pltpu.PrefetchScalarGridSpec(
            num_scalar_prefetch=0,
            grid=(rows // tm, rows // tk),
            in_specs=[
                pl.BlockSpec((tm, tk), lambda i, k: (i, k)),
                pl.BlockSpec((tk, cout), lambda i, k: (k, 0)),
                pl.BlockSpec((1, cout), lambda i, k: (0, 0)),
            ],
            out_specs=pl.BlockSpec((tm, cout), lambda i, k: (i, 0)),
            scratch_shapes=[pltpu.VMEM((tm, cout), jnp.float32)],
        ),
        compiler_params=pltpu.CompilerParams(
            dimension_semantics=("parallel", "arbitrary")),
        cost_estimate=cost,
    )(a, xw, b)


def gcn_forward_pallas(a_norm, x, w1, b1, w2, b2, wc, bc):
    n = x.shape[0]
    num_classes = wc.shape[1]

    # Lane/sublane-friendly padded sizes.
    np_pad = _round_up(max(n, 8), 128)
    cin_p = _round_up(x.shape[1], 128)
    hid_p = _round_up(w1.shape[1], 128)
    emb_p = _round_up(w2.shape[1], 128)
    cls_p = _round_up(num_classes, 128)

    # Pad + cast MXU operands to bf16 once (biases stay f32).
    a_p = _pad2(a_norm, (np_pad, np_pad)).astype(jnp.bfloat16)
    x_p = _pad2(x, (np_pad, cin_p)).astype(jnp.bfloat16)
    w1_p = _pad2(w1, (cin_p, hid_p)).astype(jnp.bfloat16)
    w2_p = _pad2(w2, (hid_p, emb_p)).astype(jnp.bfloat16)
    wc_p = _pad2(wc, (emb_p, cls_p)).astype(jnp.bfloat16)
    b1_p = _pad2(b1, (1, hid_p)).astype(jnp.float32)
    b2_p = _pad2(b2, (1, emb_p)).astype(jnp.float32)
    bc_p = _pad2(bc, (1, cls_p)).astype(jnp.float32)
    zero_hid = jnp.zeros((1, hid_p), jnp.float32)
    zero_emb = jnp.zeros((1, emb_p), jnp.float32)

    # Tile budget: modest tiles that double-buffer within v7x's 32 MiB scoped
    # VMEM; 256/512-multiples preferred for the 2x256x256 MXU on v6e/v7x.
    tm = _pick_tile(np_pad, (256, 128, 64, 32, 16, 8))
    tk = _pick_tile(np_pad, (512, 256, 128))

    # Layer 1: h1 = relu(A @ (X W1) + b1)
    xw1 = _dense(x_p, w1_p, zero_hid, apply_relu=False,
                 out_dtype=jnp.bfloat16, tm=tm)
    h1 = _aggregate(a_p, xw1, b1_p, apply_relu=True,
                    out_dtype=jnp.bfloat16, tm=tm, tk=tk)

    # Layer 2: h2 = A @ (h1 W2) + b2 ; forward() then applies relu before the
    # classifier, so fuse the relu into the aggregation finalize.
    xw2 = _dense(h1, w2_p, zero_emb, apply_relu=False,
                 out_dtype=jnp.bfloat16, tm=tm)
    h2r = _aggregate(a_p, xw2, b2_p, apply_relu=True,
                     out_dtype=jnp.bfloat16, tm=tm, tk=tk)

    # Classifier: logits = relu(h2) @ Wc + bc (lane-dense [N, 128] output slab).
    logits = _dense(h2r, wc_p, bc_p, apply_relu=False,
                    out_dtype=jnp.float32, tm=tm)

    return logits[:n, :num_classes]


# ----------------------------- Glue (plain JAX) ------------------------------ #
def build_normalized_adjacency(edge_index, num_nodes):
    """Dense D^{-1/2} (A + I) D^{-1/2}, matching PyG gcn_norm defaults.

    Self-loops are only added where none already exist (add_remaining_self_loops).
    """
    src = edge_index[0]
    dst = edge_index[1]
    a = jnp.zeros((num_nodes, num_nodes), jnp.float32)
    a = a.at[dst, src].add(1.0)                      # message j -> i lands in row i
    diag = jnp.diagonal(a)
    a = a + jnp.diag(jnp.where(diag == 0.0, 1.0, 0.0))
    deg = a.sum(axis=1)                              # in-degree incl. self-loop
    dinv = jnp.where(deg > 0, jax.lax.rsqrt(deg), 0.0)
    return dinv[:, None] * a * dinv[None, :]


def init_params(key, in_channels, hidden_channels, embedded_dim, num_classes):
    ks = jax.random.split(key, 6)
    w1 = jax.random.normal(ks[0], (in_channels, hidden_channels), jnp.float32) * 0.2
    b1 = jax.random.normal(ks[1], (1, hidden_channels), jnp.float32) * 0.05
    w2 = jax.random.normal(ks[2], (hidden_channels, embedded_dim), jnp.float32) * 0.2
    b2 = jax.random.normal(ks[3], (1, embedded_dim), jnp.float32) * 0.05
    # torch.nn.Linear stores weight [num_classes, embedded_dim]; pre-transposed here.
    wc = jax.random.normal(ks[4], (embedded_dim, num_classes), jnp.float32) * 0.2
    bc = jax.random.normal(ks[5], (1, num_classes), jnp.float32) * 0.05
    return w1, b1, w2, b2, wc, bc


def gcn_reference_bf16(a, x, w1, b1, w2, b2, wc, bc):
    """Reference mirroring the kernel's bf16-operand / f32-accumulate math."""
    def mm(p, q):
        return jnp.dot(p.astype(jnp.bfloat16), q.astype(jnp.bfloat16),
                       preferred_element_type=jnp.float32)
    xw1 = mm(x, w1).astype(jnp.bfloat16)
    h1 = jnp.maximum(mm(a, xw1) + b1, 0.0).astype(jnp.bfloat16)
    xw2 = mm(h1, w2).astype(jnp.bfloat16)
    h2 = jnp.maximum(mm(a, xw2) + b2, 0.0).astype(jnp.bfloat16)
    return mm(h2, wc) + bc


def gcn_reference_f32(a, x, w1, b1, w2, b2, wc, bc):
    h1 = jnp.maximum(a @ (x @ w1) + b1, 0.0)
    h2 = a @ (h1 @ w2) + b2
    return jnp.maximum(h2, 0.0) @ wc + bc


if __name__ == "__main__":
    key = jax.random.PRNGKey(0)

    # Small sizes consistent with the module's forward.
    num_nodes = 16
    in_channels = 8
    hidden_channels = 16
    embedded_dim = 8
    num_classes = 4
    num_edges = 32

    k_x, k_src, k_dst, k_p = jax.random.split(key, 4)
    x = jax.random.normal(k_x, (num_nodes, in_channels), jnp.float32)
    edge_index = jnp.stack(
        [jax.random.randint(k_src, (num_edges,), 0, num_nodes),
         jax.random.randint(k_dst, (num_edges,), 0, num_nodes)],
        axis=0,
    ).astype(jnp.int32)

    a_norm = build_normalized_adjacency(edge_index, num_nodes)
    w1, b1, w2, b2, wc, bc = init_params(
        k_p, in_channels, hidden_channels, embedded_dim, num_classes)

    out = gcn_forward_pallas(a_norm, x, w1, b1, w2, b2, wc, bc)
    out = jax.block_until_ready(out)
    assert out.shape == (num_nodes, num_classes)

    # Tight check vs. a reference that emulates the kernel's bf16/f32 math.
    ref_bf16 = gcn_reference_bf16(a_norm, x, w1, b1, w2, b2, wc, bc)
    assert jnp.allclose(out, ref_bf16, atol=1e-2, rtol=1e-2)

    # Loose sanity check vs. the pure-f32 module semantics.
    ref_f32 = gcn_reference_f32(a_norm, x, w1, b1, w2, b2, wc, bc)
    assert jnp.allclose(out, ref_f32, atol=1e-1, rtol=1e-1)

    print("KERNEL_OK")
</pallas_src>

<mosaic_0001>
module attributes {stable_mosaic.version = 11 : i64} {
  func.func @dense_kernel(%arg0: i32, %arg1: memref<128x128xbf16, #tpu.memory_space<vmem>>, %arg2: memref<128x128xbf16, #tpu.memory_space<vmem>>, %arg3: memref<1x128xf32, #tpu.memory_space<vmem>>, %arg4: memref<128x128xbf16, #tpu.memory_space<vmem>>) attributes {dimension_semantics = [#tpu.dimension_semantics<parallel>], iteration_bounds = array<i64: 1>, scalar_prefetch = 0 : i64, scratch_operands = 0 : i64, tpu.core_type = #tpu.core_type<tc>, window_params = [{transform_indices = @transform_0, window_bounds = array<i64: 128, 128>}, {pipeline_mode = #tpu.pipeline_mode<synchronous>, transform_indices = @transform_1, window_bounds = array<i64: 128, 128>}, {pipeline_mode = #tpu.pipeline_mode<synchronous>, transform_indices = @transform_2, window_bounds = array<i64: 1, 128>}, {transform_indices = @transform_3, window_bounds = array<i64: 128, 128>}]} {
    %c0 = arith.constant 0 : index
    %c0_0 = arith.constant 0 : index
    %0 = vector.load %arg1[%c0, %c0_0] : memref<128x128xbf16, #tpu.memory_space<vmem>>, vector<128x128xbf16>
    %c0_1 = arith.constant 0 : index
    %c0_2 = arith.constant 0 : index
    %1 = vector.load %arg2[%c0_1, %c0_2] : memref<128x128xbf16, #tpu.memory_space<vmem>>, vector<128x128xbf16>
    %cst = arith.constant dense<0.000000e+00> : vector<128x128xf32>
    %2 = tpu.matmul %0, %1, %cst {dimension_numbers = #tpu.dot_dimension_numbers<[1], [0], [0], [1], [0, 0, 1, 1], [], []>} : vector<128x128xbf16>, vector<128x128xbf16>, vector<128x128xf32> -> vector<128x128xf32>
    %c0_3 = arith.constant 0 : index
    %c0_4 = arith.constant 0 : index
    %3 = vector.load %arg3[%c0_3, %c0_4] : memref<1x128xf32, #tpu.memory_space<vmem>>, vector<1x128xf32>
    %4 = vector.broadcast %3 : vector<1x128xf32> to vector<128x128xf32>
    %5 = arith.addf %2, %4 : vector<128x128xf32>
    %6 = arith.truncf %5 : vector<128x128xf32> to vector<128x128xbf16>
    %c0_5 = arith.constant 0 : index
    %c0_6 = arith.constant 0 : index
    %7 = vector.load %arg4[%c0_5, %c0_6] : memref<128x128xbf16, #tpu.memory_space<vmem>>, vector<128x128xbf16>
    tpu.vector_store %arg4[%c0_5, %c0_6], %6 {strides = array<i32>} : memref<128x128xbf16, #tpu.memory_space<vmem>>, vector<128x128xbf16>,
    return
  }
  func.func @transform_0(%arg0: i32) -> (i32, i32) {
    %c0_i32 = arith.constant 0 : i32
    %c0_i32_0 = arith.constant 0 : i32
    return %arg0, %c0_i32 : i32, i32
  }
  func.func @transform_1(%arg0: i32) -> (i32, i32) {
    %c0_i32 = arith.constant 0 : i32
    %c0_i32_0 = arith.constant 0 : i32
    %c0_i32_1 = arith.constant 0 : i32
    return %c0_i32, %c0_i32_0 : i32, i32
  }
  func.func @transform_2(%arg0: i32) -> (i32, i32) {
    %c0_i32 = arith.constant 0 : i32
    %c0_i32_0 = arith.constant 0 : i32
    %c0_i32_1 = arith.constant 0 : i32
    return %c0_i32, %c0_i32_0 : i32, i32
  }
  func.func @transform_3(%arg0: i32) -> (i32, i32) {
    %c0_i32 = arith.constant 0 : i32
    %c0_i32_0 = arith.constant 0 : i32
    return %arg0, %c0_i32 : i32, i32
  }
}

</mosaic_0001>

<bundles_post_ra>
// kernel: tpu_custom_call.1
= control target key start
LH: loop header
LB: loop body
LE: loop exit
PB: predicated region body
PF: predicated region fallthrough
CT: control target
= control target key end

     0   :  { %8 = vsyncpa [#allocation3], 0  ;;  %s667_s0 = inlined_call_operand.hbm [shape: bf16[128,128], index: 0, kind: input, shape index: {}]   ;;  %s668_s1 = inlined_call_operand.hbm [shape: bf16[128,128], index: 1, kind: input, shape index: {}]   ;;  %s669_s2 = inlined_call_operand.vmem [shape: f32[1,128], index: 2, kind: input, shape index: {}]   ;;  %s670_s3 = inlined_call_operand.hbm [shape: bf16[128,128], index: 3, kind: output, shape index: {}]  }
   0x1   :  { %9 = vsyncpa [#allocation6], 0 }
   0x2   :  { %10 = vsyncpa [#allocation4], 0  ;;  %s621_s12 = smov [#allocation2]  }
   0x3   :  { %s16_s13 = sshll.u32 %s621_s12, 4  ;;  %s17_s13 = int_to_ptr.vmem [resolvable:$true] %s16_s13 }
   0x4   :  { %s563_s14 = scalar_lea.vmem %s17_s13, 1024  ;;  %p568_p1 = scmp.lt.s32.totalorder %s17_s13, %s17_s13 }
   0x5   :  { %p564_p0 = scmp.ne.s32.totalorder %s17_s13, %s563_s14  ;;  %p569_p2 = scmp.lt.s32.totalorder %s563_s14, %s563_s14 }
   0x7   :  { %p570_p3 = por %p569_p2, %p568_p1 }
   0x9   :  { %p571_p4 = pnand %p570_p3, %p564_p0 }
   0xb   :  { %574 = shalt.err (!%p571_p4)
}
   0xc   :  { %s622_s15 = smov 64   ;;  %s623_s16 = smov 4  }
   0xd   :  { %22 = dma.hbm_to_vmem [thread:$0]  %s667_s0, 1024, %s17_s13, [#allocation3], %s622_s15, %s622_s15, %s623_s16  }
   0xe   :  { %s624_s19 = smov [#allocation5]  }
   0xf   :  { %s28_s20 = sshll.u32 %s624_s19, 4  ;;  %s29_s20 = int_to_ptr.vmem [resolvable:$true] %s28_s20 }
  0x10   :  { %s583_s21 = scalar_lea.vmem %s29_s20, 1024  ;;  %p588_p6 = scmp.lt.s32.totalorder %s29_s20, %s29_s20 }
  0x11   :  { %p584_p5 = scmp.ne.s32.totalorder %s29_s20, %s583_s21  ;;  %p589_p7 = scmp.lt.s32.totalorder %s583_s21, %s583_s21 }
  0x13   :  { %p590_p8 = por %p589_p7, %p588_p6 }
  0x15   :  { %p591_p9 = pnand %p590_p8, %p584_p5 }
  0x17   :  { %594 = shalt.err (!%p591_p9)
}
  0x18   :  { %34 = dma.hbm_to_vmem [thread:$0]  %s668_s1, 1024, %s29_s20, [#allocation6], %s622_s15, %s622_s15, %s623_s16  }
  0x19   :  { %615 = dma.done.wait [#allocation3], 1024  }
  0x1a   :  { %616 = vsyncadd [#allocation3], 4294966272 }
  0x1b   :  { %617 = dma.done.wait [#allocation6], 1024  }
  0x1c   :  { %618 = vsyncadd [#allocation6], 4294966272  ;;  %v539_v0 = vld [vmem:[#allocation5 + $0x38] sm:$0xff]   ;;  %v540_v1 = vld [vmem:[#allocation5 + $0x30] sm:$0xff]  }
  0x1d   :  { %486 = vmatprep.subr.bf16.mxu0 %v539_v0  ;;  %518 = vmatprep.subr.bf16.mxu1 %v539_v0  ;;  %v541_v2 = vld [vmem:[#allocation5 + $0x28] sm:$0xff]   ;;  %v542_v3 = vld [vmem:[#allocation5 + $0x20] sm:$0xff]   ;;  %v543_v6 = vld [vmem:[#allocation5 + $0x18] sm:$0xff]  }
  0x1e   :  { %487 = vmatpush3.bf16.msra.mxu0 %v539_v0  ;;  %526 = vmatpush3.bf16.msra.mxu1 %v539_v0  ;;  %v547_v4 = vld [vmem:[#allocation2] sm:$0xff]   ;;  %v544_v7 = vld [vmem:[#allocation5 + $0x10] sm:$0xff]   ;;  %v545_v8 = vld [vmem:[#allocation5 + $0x8] sm:$0xff]  }
  0x1f   :  { %488 = vmatprep.subr.bf16.mxu0 %v540_v1  ;;  %519 = vmatprep.subr.bf16.mxu1 %v540_v1  ;;  %v548_v5 = vld [vmem:[#allocation2 + $0x20] sm:$0xff]   ;;  %v549_v10 = vld [vmem:[#allocation2 + $0x8] sm:$0xff]   ;;  %v551_v12 = vld [vmem:[#allocation2 + $0x10] sm:$0xff]  }
  0x20   :  { %502 = vmatprep.mubr.bf16.mxu0 %v547_v4  ;;  %510 = vmatprep.mubr.bf16.mxu1 %v548_v5  ;;  %v546_v9 = vld [vmem:[#allocation5] sm:$0xff]   ;;  %v550_v11 = vld [vmem:[#allocation2 + $0x28] sm:$0xff]   ;;  %v552_v13 = vld [vmem:[#allocation2 + $0x30] sm:$0xff]  }
  0x21   :  { %v553_v14 = vld [vmem:[#allocation2 + $0x18] sm:$0xff]   ;;  %v374_v18 = vld [vmem:[%s669_s2] ss:$0 sm:$0xff]  ;;  %s625_s2 = smov [#allocation7]  }
  0x22   :  { %489 = vmatpush3.bf16.msra.mxu0 %v540_v1  ;;  %527 = vmatpush3.bf16.msra.mxu1 %v540_v1  ;;  %v554_v15 = vld [vmem:[#allocation2 + $0x38] sm:$0xff]   ;;  %s361_s24 = sshll.u32 %s625_s2, 4  ;;  %s362_s24 = int_to_ptr.vmem [resolvable:$true] %s361_s24 }
  0x23   :  { %490 = vmatprep.subr.bf16.mxu0 %v541_v2  ;;  %520 = vmatprep.subr.bf16.mxu1 %v541_v2  ;;  %s595_s25 = scalar_lea.vmem %s362_s24, 1024  ;;  %p600_p11 = scmp.lt.s32.totalorder %s362_s24, %s362_s24 }
  0x24   :  { %p596_p10 = scmp.ne.s32.totalorder %s362_s24, %s595_s25  ;;  %p601_p12 = scmp.lt.s32.totalorder %s595_s25, %s595_s25 }
  0x26   :  { %491 = vmatpush3.bf16.msra.mxu0 %v541_v2  ;;  %528 = vmatpush3.bf16.msra.mxu1 %v541_v2  ;;  %p602_p13 = por %p601_p12, %p600_p11 }
  0x27   :  { %492 = vmatprep.subr.bf16.mxu0 %v542_v3  ;;  %521 = vmatprep.subr.bf16.mxu1 %v542_v3 }
  0x28   :  { %p603_p0 = pnand %p602_p13, %p596_p10 }
  0x2a   :  { %493 = vmatpush3.bf16.msra.mxu0 %v542_v3  ;;  %529 = vmatpush3.bf16.msra.mxu1 %v542_v3 }
  0x2b   :  { %494 = vmatprep.subr.bf16.mxu0 %v543_v6  ;;  %522 = vmatprep.subr.bf16.mxu1 %v543_v6 }
  0x2e   :  { %495 = vmatpush3.bf16.msra.mxu0 %v543_v6  ;;  %530 = vmatpush3.bf16.msra.mxu1 %v543_v6 }
  0x2f   :  { %496 = vmatprep.subr.bf16.mxu0 %v544_v7  ;;  %523 = vmatprep.subr.bf16.mxu1 %v544_v7 }
  0x32   :  { %497 = vmatpush3.bf16.msra.mxu0 %v544_v7  ;;  %531 = vmatpush3.bf16.msra.mxu1 %v544_v7 }
  0x33   :  { %498 = vmatprep.subr.bf16.mxu0 %v545_v8  ;;  %524 = vmatprep.subr.bf16.mxu1 %v545_v8 }
  0x36   :  { %499 = vmatpush3.bf16.msra.mxu0 %v545_v8  ;;  %532 = vmatpush3.bf16.msra.mxu1 %v545_v8 }
  0x37   :  { %500 = vmatprep.subr.bf16.mxu0 %v546_v9  ;;  %525 = vmatprep.subr.bf16.mxu1 %v546_v9 }
  0x3a   :  { %501 = vmatpush3.bf16.msra.mxu0 %v546_v9  ;;  %533 = vmatpush3.bf16.msra.mxu1 %v546_v9 }
  0x3d   :  { %503 = vmatmul.mubr.bf16.vlgmr.msra.gmra.mxu0 %v549_v10  ;;  %511 = vmatmul.mubr.bf16.vlgmr.msra.gmra.mxu1 %v550_v11 }
  0x3e   :  { %506 = vmatprep.mubr.bf16.mxu0 %v551_v12  ;;  %514 = vmatprep.mubr.bf16.mxu1 %v552_v13 }
  0x45   :  { %507 = vmatmul.mubr.bf16.gmra.mxu0 %v553_v14  ;;  %515 = vmatmul.mubr.bf16.gmra.mxu1 %v554_v15 }
  0xfd   :  { %v504_v16 = vpop.f32.mrf.mxu0  ;;  %v512_v17 = vpop.f32.mrf.mxu1 }
  0xfe   :  { %v222_v23 = vadd.f32 %v504_v16, %v374_v18  ;;  %v254_v24 = vadd.f32 %v512_v17, %v374_v18 }
  0xff   :  { %v213_v19 = vpop.f32.mrf.mxu0  ;;  %v245_v20 = vpop.f32.mrf.mxu1 }
 0x100   :  { %v214_v27 = vadd.f32 %v374_v18, %v213_v19  ;;  %v246_v28 = vadd.f32 %v374_v18, %v245_v20 }
 0x101   :  { %v505_v21 = vpop.f32.mrf.mxu0  ;;  %v513_v22 = vpop.f32.mrf.mxu1 }
 0x102   :  { %v225_v25 = vadd.f32 %v505_v21, %v374_v18  ;;  %v257_v26 = vadd.f32 %v513_v22, %v374_v18 }
 0x103   :  { %v216_v29 = vpop.f32.mrf.mxu0  ;;  %v248_v30 = vpop.f32.mrf.mxu1 }
 0x104   :  { %v431_v31 = vpack.c.bf16 %v225_v25, %v222_v23  ;;  %v451_v32 = vpack.c.bf16 %v257_v26, %v254_v24  ;;  %v217_v33 = vadd.f32 %v374_v18, %v216_v29  ;;  %v249_v34 = vadd.f32 %v374_v18, %v248_v30 }
 0x105   :  { %v508_v35 = vpop.f32.mrf.mxu0  ;;  %v516_v36 = vpop.f32.mrf.mxu1 }
 0x106   :  { %463 = vst [vmem:[#allocation7 + $0x8] sm:$0xff] %v431_v31   ;;  %467 = vst [vmem:[#allocation7 + $0x28] sm:$0xff] %v451_v32   ;;  %v426_v37 = vpack.c.bf16 %v217_v33, %v214_v27  ;;  %v446_v38 = vpack.c.bf16 %v249_v34, %v246_v28  ;;  %v238_v43 = vadd.f32 %v508_v35, %v374_v18 }
 0x107   :  { %v229_v39 = vpop.f32.mrf.mxu0  ;;  %v261_v40 = vpop.f32.mrf.mxu1  ;;  %v270_v44 = vadd.f32 %v516_v36, %v374_v18 }
 0x108   :  { %427 = vst [vmem:[#allocation7] sm:$0xff] %v426_v37   ;;  %466 = vst [vmem:[#allocation7 + $0x20] sm:$0xff] %v446_v38   ;;  %v230_v47 = vadd.f32 %v374_v18, %v229_v39  ;;  %v262_v48 = vadd.f32 %v374_v18, %v261_v40 }
 0x109   :  { %v509_v41 = vpop.f32.mrf.mxu0  ;;  %v517_v42 = vpop.f32.mrf.mxu1 }
 0x10a   :  { %v241_v45 = vadd.f32 %v509_v41, %v374_v18  ;;  %v273_v46 = vadd.f32 %v517_v42, %v374_v18 }
 0x10b   :  { %v232_v49 = vpop.f32.mrf.mxu0  ;;  %v264_v50 = vpop.f32.mrf.mxu1 }
 0x10c   :  { %v441_v51 = vpack.c.bf16 %v241_v45, %v238_v43  ;;  %v461_v52 = vpack.c.bf16 %v273_v46, %v270_v44  ;;  %v233_v53 = vadd.f32 %v374_v18, %v232_v49  ;;  %v265_v54 = vadd.f32 %v374_v18, %v264_v50 }
 0x10e   :  { %465 = vst [vmem:[#allocation7 + $0x18] sm:$0xff] %v441_v51   ;;  %469 = vst [vmem:[#allocation7 + $0x38] sm:$0xff] %v461_v52   ;;  %v436_v55 = vpack.c.bf16 %v233_v53, %v230_v47  ;;  %v456_v56 = vpack.c.bf16 %v265_v54, %v262_v48 }
 0x110   :  { %464 = vst [vmem:[#allocation7 + $0x10] sm:$0xff] %v436_v55   ;;  %468 = vst [vmem:[#allocation7 + $0x30] sm:$0xff] %v456_v56  }
 0x111   :  { %606 = shalt.err (!%p603_p0)
}
 0x112   :  { %367 = dma.vmem_to_hbm [thread:$0]  %s362_s24, 1024, %s670_s3, [#allocation4], %s622_s15, %s622_s15, %s623_s16  }
 0x113   :  { %619 = dma.done.wait [#allocation4], 1024  }
 0x114   :  { %620 = vsyncadd [#allocation4], 4294966272 }
 0x115   :  { %371 = vsyncpa [#allocation3], 1 }
 0x116   :  { %372 = vsyncpa [#allocation6], 1 }
 0x117   :  { %373 = vsyncpa [#allocation4], 1 }

</bundles_post_ra>
